<compile_context>
chip_gen: v5e
topology: v5e:2x2
jax: 0.10.0
libtpu: 0.0.40
codegen_flags: <defaults>
</compile_context>

<pallas_src>
import jax
import jax.numpy as jnp
import numpy as np
from jax import lax
from jax.experimental import pallas as pl
from jax.experimental.pallas import tpu as pltpu


def _vmem_limit_bytes():
    """Scoped-VMEM budget derived from the device (v7x: 64 MiB physical,
    v5e/v6e: 128 MiB); conservative fallback if the query is unavailable."""
    cap = 64 * 1024 * 1024
    try:
        info = pltpu.get_tpu_info()
        cap = int(getattr(info, "vmem_capacity_bytes", cap)) or cap
    except Exception:
        pass
    return min(int(cap * 0.70), 96 * 1024 * 1024)


def _round_tile(t, HW):
    if t >= HW:
        return HW                         # full extent: no masking, any HW ok
    return max(128, (t // 128) * 128)     # lane-aligned tile


def _pick_tiles(HW, N, C, isize, vmem_limit):
    """Separate spatial tiles for the reduce phase (only x streamed) and the
    apply phase (x in + out).  Both are double-buffered by the pipeline."""
    budget = int(0.55 * vmem_limit)
    t1 = budget // max(2 * N * C * isize, 1)      # reduce: input only
    t2 = budget // max(4 * N * C * isize, 1)      # apply: input + output
    return _round_tile(t1, HW), _round_tile(t2, HW)


def _neg_attention(sum_relu, sum_x, w1a, w1b, b1, gamma, beta, w2, b2, inv_hw):
    """fc1 -> BatchNorm1d (training-mode batch stats) -> ReLU -> fc2 -> sigmoid.
    Takes the spatial sums of relu(x) and x; returns -a (N, C) in f32."""
    gap_relu = sum_relu * inv_hw                      # mean(relu(x))   (N, C)
    gap_neg = (sum_x - sum_relu) * inv_hw             # mean(min(x, 0)) (N, C)
    h = (jnp.dot(gap_relu, w1a, preferred_element_type=jnp.float32)
         + jnp.dot(gap_neg, w1b, preferred_element_type=jnp.float32) + b1)
    mu = jnp.mean(h, axis=0, keepdims=True)
    var = jnp.mean((h - mu) * (h - mu), axis=0, keepdims=True)
    h = (h - mu) * lax.rsqrt(var + 1e-5) * gamma + beta
    h = jnp.maximum(h, 0.0)
    a = jax.nn.sigmoid(jnp.dot(h, w2, preferred_element_type=jnp.float32) + b2)
    return -a


def apam_forward(x_nchw, params, gap_size=1, tile_hw=None, force_multipass=False):
    assert gap_size == 1, "fc dims only consistent with gap_size == 1"
    w1, b1, gamma, beta, w2, b2 = (p.astype(jnp.float32) for p in params)
    N, C, H, W = x_nchw.shape
    HW = H * W
    dtype = x_nchw.dtype
    isize = jnp.dtype(dtype).itemsize
    x = x_nchw.reshape(N, C, HW)                 # native dtype, free reshape
    w1a, w1b = w1[:C], w1[C:]                    # avoid an in-kernel lane concat
    inv_hw = 1.0 / float(HW)
    vmem_limit = _vmem_limit_bytes()
    weight_bytes = (3 * C * C + 4 * C) * 4

    def _const_spec(shape):
        return pl.BlockSpec(shape, lambda s: (0,) * len(shape))

    def _cparams(sem):
        return pltpu.CompilerParams(dimension_semantics=sem,
                                    vmem_limit_bytes=vmem_limit)

    # ------------- fused single-pass path (x resident in VMEM) --------------
    fused_bytes = N * C * HW * (2 * isize + 2 * isize + 16) + weight_bytes
    if (not force_multipass) and tile_hw is None and fused_bytes <= int(0.8 * vmem_limit):
        def fused_kernel(x_ref, w1a_ref, w1b_ref, b1_ref, g_ref, be_ref,
                         w2_ref, b2_ref, o_ref):
            xf = x_ref[...].astype(jnp.float32)                  # (N, C, HW)
            x_relu = jnp.maximum(xf, 0.0)
            neg_a = _neg_attention(
                jnp.sum(x_relu, axis=2), jnp.sum(xf, axis=2),
                w1a_ref[...], w1b_ref[...], b1_ref[...], g_ref[...],
                be_ref[...], w2_ref[...], b2_ref[...], inv_hw)
            na = neg_a[:, :, None]                               # (N, C, 1)
            y = x_relu + jnp.maximum(jnp.minimum(xf, 0.0), na)
            o_ref[...] = y.astype(o_ref.dtype)

        out = pl.pallas_call(
            fused_kernel,
            out_shape=jax.ShapeDtypeStruct((N, C, HW), dtype),
            grid=(1,),
            in_specs=[_const_spec((N, C, HW)),
                      _const_spec((C, C)), _const_spec((C, C)), _const_spec((1, C)),
                      _const_spec((1, C)), _const_spec((1, C)),
                      _const_spec((C, C)), _const_spec((1, C))],
            out_specs=_const_spec((N, C, HW)),
            compiler_params=_cparams(("arbitrary",)),
            cost_estimate=pl.CostEstimate(
                flops=int(7 * N * C * HW + 4 * N * C * C),
                transcendentals=int(N * C),
                bytes_accessed=int(2 * N * C * HW * isize + weight_bytes)),
        )(x, w1a, w1b, b1, gamma, beta, w2, b2)
        return out.reshape(N, C, H, W)

    # ------------- multi-pass path ------------------------------------------
    if tile_hw is not None:
        T1 = T2 = _round_tile(int(tile_hw), HW)
    else:
        T1, T2 = _pick_tiles(HW, N, C, isize, vmem_limit)

    n_tiles1 = pl.cdiv(HW, T1)
    P = 2 if n_tiles1 >= 2 else 1            # split the reduction across 2 TCs (v7x)
    n_inner = pl.cdiv(n_tiles1, P)
    padded = n_inner * P > n_tiles1          # some logical tiles fall past n_tiles1
    needs_mask = padded or (HW % T1 != 0)

    if padded:
        # Clamp the block index for the (fully masked) padding tiles so the
        # auto-DMA never reads outside x; masking uses the *logical* index.
        x_idx1 = lambda p, t: (0, 0, jnp.minimum(p * n_inner + t, n_tiles1 - 1))
    else:
        x_idx1 = lambda p, t: (0, 0, p * n_inner + t)

    # -- phase 1: per-chunk partial sums of relu(x) and x over the spatial axis
    def reduce_kernel(x_ref, psum_ref, sum_relu, sum_x):
        p = pl.program_id(0)
        t = pl.program_id(1)

        @pl.when(t == 0)
        def _init():
            sum_relu[...] = jnp.zeros_like(sum_relu)
            sum_x[...] = jnp.zeros_like(sum_x)

        xt = x_ref[...].astype(jnp.float32)                      # (N, C, T1)
        if needs_mask:
            g = p * n_inner + t                                  # logical tile index
            is_edge = (g + 1) * T1 > HW

            @pl.when(jnp.logical_not(is_edge))
            def _full():
                sum_relu[...] += jnp.sum(jnp.maximum(xt, 0.0), axis=2)
                sum_x[...] += jnp.sum(xt, axis=2)

            @pl.when(is_edge)
            def _edge():
                lane = lax.broadcasted_iota(jnp.int32, (1, 1, T1), 2)
                valid = lane < (HW - g * T1)
                xm = jnp.where(valid, xt, 0.0)
                sum_relu[...] += jnp.sum(jnp.maximum(xm, 0.0), axis=2)
                sum_x[...] += jnp.sum(xm, axis=2)
        else:
            sum_relu[...] += jnp.sum(jnp.maximum(xt, 0.0), axis=2)
            sum_x[...] += jnp.sum(xt, axis=2)

        @pl.when(t == pl.num_programs(1) - 1)
        def _writeout():
            psum_ref[0, 0, :, :] = sum_relu[...]
            psum_ref[0, 1, :, :] = sum_x[...]

    psum = pl.pallas_call(
        reduce_kernel,
        out_shape=jax.ShapeDtypeStruct((P, 2, N, C), jnp.float32),
        grid=(P, n_inner),
        in_specs=[pl.BlockSpec((N, C, T1), x_idx1)],
        out_specs=pl.BlockSpec((1, 2, N, C), lambda p, t: (p, 0, 0, 0)),
        scratch_shapes=[pltpu.VMEM((N, C), jnp.float32),
                        pltpu.VMEM((N, C), jnp.float32)],
        compiler_params=_cparams(("parallel", "arbitrary")),
        cost_estimate=pl.CostEstimate(
            flops=int(3 * N * C * HW), transcendentals=0,
            bytes_accessed=int(N * C * HW * isize + P * 2 * N * C * 4)),
    )(x)

    # -- phase 2: tiny epilogue — combine partials, fc/BN/ReLU/fc/sigmoid, -a
    def epilogue_kernel(psum_ref, w1a_ref, w1b_ref, b1_ref, g_ref, be_ref,
                        w2_ref, b2_ref, nega_ref):
        ps = psum_ref[...]                                       # (P, 2, N, C)
        neg_a = _neg_attention(
            jnp.sum(ps[:, 0], axis=0), jnp.sum(ps[:, 1], axis=0),
            w1a_ref[...], w1b_ref[...], b1_ref[...], g_ref[...],
            be_ref[...], w2_ref[...], b2_ref[...], inv_hw)
        nega_ref[...] = neg_a[:, :, None]     # (N, C, 1): one-time lanes->sublanes

    neg_a = pl.pallas_call(
        epilogue_kernel,
        out_shape=jax.ShapeDtypeStruct((N, C, 1), jnp.float32),
        grid=(1,),
        in_specs=[_const_spec((P, 2, N, C)),
                  _const_spec((C, C)), _const_spec((C, C)), _const_spec((1, C)),
                  _const_spec((1, C)), _const_spec((1, C)),
                  _const_spec((C, C)), _const_spec((1, C))],
        out_specs=_const_spec((N, C, 1)),
        compiler_params=_cparams(("arbitrary",)),
    )(psum, w1a, w1b, b1, gamma, beta, w2, b2)

    # -- phase 3: out = relu(x) + max(min(x, 0), -a), lane-dense streaming ----
    n_tiles2 = pl.cdiv(HW, T2)

    # Partial last block: Pallas clips the block write-back at the array
    # boundary and the op is purely elementwise, so out-of-range lanes never
    # influence valid outputs (validated in the test configs below).
    def apply_kernel(nega_ref, x_ref, o_ref):
        xt = x_ref[...].astype(jnp.float32)                      # (N, C, T2)
        na = nega_ref[...]                                       # (N, C, 1) lane splat
        y = jnp.maximum(xt, 0.0) + jnp.maximum(jnp.minimum(xt, 0.0), na)
        o_ref[...] = y.astype(o_ref.dtype)

    out = pl.pallas_call(
        apply_kernel,
        out_shape=jax.ShapeDtypeStruct((N, C, HW), dtype),
        grid=(n_tiles2,),
        in_specs=[pl.BlockSpec((N, C, 1), lambda s: (0, 0, 0)),
                  pl.BlockSpec((N, C, T2), lambda s: (0, 0, s))],
        out_specs=pl.BlockSpec((N, C, T2), lambda s: (0, 0, s)),
        compiler_params=_cparams(("parallel",)),
        cost_estimate=pl.CostEstimate(
            flops=int(3 * N * C * HW), transcendentals=0,
            bytes_accessed=int(2 * N * C * HW * isize + N * C * 4)),
    )(neg_a, x)

    return out.reshape(N, C, H, W)


def apam_reference(x_nchw, params):
    """Pure-JAX reference mirroring the PyTorch forward (for verification)."""
    w1, b1, gamma, beta, w2, b2 = (p.astype(jnp.float32) for p in params)
    x = x_nchw.astype(jnp.float32)
    x_relu = jnp.maximum(x, 0.0)
    x_neg = jnp.minimum(x, 0.0)
    gap_relu = jnp.mean(x_relu, axis=(2, 3))
    gap_neg = jnp.mean(x_neg, axis=(2, 3))
    feat = jnp.concatenate([gap_relu, gap_neg], axis=1)
    h = feat @ w1 + b1
    mu = jnp.mean(h, axis=0, keepdims=True)
    var = jnp.mean((h - mu) ** 2, axis=0, keepdims=True)
    h = (h - mu) / jnp.sqrt(var + 1e-5) * gamma + beta
    h = jnp.maximum(h, 0.0)
    a = jax.nn.sigmoid(h @ w2 + b2)
    a = a[:, :, None, None]
    return x_relu + jnp.maximum(x_neg, -a)


def init_params(channel, key):
    k1, k2, k3, k4 = jax.random.split(key, 4)
    c = channel
    # Weights stored transposed (in, out) so the kernels right-multiply.
    w1 = jax.random.normal(k1, (2 * c, c), jnp.float32) * 0.1    # fc1.weight.T
    b1 = jax.random.normal(k2, (1, c), jnp.float32) * 0.1        # fc1.bias
    gamma = jnp.ones((1, c), jnp.float32)                        # bn.weight
    beta = jnp.zeros((1, c), jnp.float32)                        # bn.bias
    w2 = jax.random.normal(k3, (c, c), jnp.float32) * 0.1        # fc2.weight.T
    b2 = jax.random.normal(k4, (1, c), jnp.float32) * 0.1        # fc2.bias
    return (w1, b1, gamma, beta, w2, b2)


if __name__ == "__main__":
    key = jax.random.PRNGKey(0)

    def _check(x, params, out, tol):
        ref = jax.block_until_ready(apam_reference(x, params))
        np.testing.assert_allclose(np.asarray(out, dtype=np.float32),
                                   np.asarray(ref), rtol=tol, atol=tol)

    # Config A: tiny f32 input -> fused single-pass path (x resident in VMEM).
    N, C, H, W = 2, 32, 16, 16
    kx, kp, key = jax.random.split(key, 3)
    x = jax.random.normal(kx, (N, C, H, W), jnp.float32)
    params = init_params(C, kp)
    out = jax.block_until_ready(apam_forward(x, params, gap_size=1))
    assert out.shape == x.shape and out.dtype == x.dtype
    _check(x, params, out, 1e-4)

    # Config B: forced multi-pass path with an odd tile count and a partial
    # last tile (HW = 324, T = 128 -> 3 tiles split over the parallel axis of 2
    # with a clamped, fully-masked padding tile).
    N, C, H, W = 4, 32, 18, 18
    kx, kp, key = jax.random.split(key, 3)
    x = jax.random.normal(kx, (N, C, H, W), jnp.float32)
    params = init_params(C, kp)
    out = jax.block_until_ready(
        apam_forward(x, params, gap_size=1, tile_hw=128, force_multipass=True))
    assert out.dtype == x.dtype
    _check(x, params, out, 1e-4)

    # Config C: bf16 activations streamed in native dtype through the
    # multi-pass path with an even tile split (HW = 256, T = 128 -> 2 tiles,
    # one per parallel chunk, no masking).
    N, C, H, W = 2, 16, 16, 16
    kx, kp = jax.random.split(key)
    x = jax.random.normal(kx, (N, C, H, W), jnp.float32).astype(jnp.bfloat16)
    params = init_params(C, kp)
    out = jax.block_until_ready(
        apam_forward(x, params, gap_size=1, tile_hw=128, force_multipass=True))
    assert out.dtype == jnp.bfloat16
    _check(x, params, out, 3e-2)

    print("KERNEL_OK")
</pallas_src>

<mosaic_0001>
module attributes {stable_mosaic.version = 11 : i64} {
  func.func @fused_kernel(%arg0: i32, %arg1: memref<2x32x256xf32, #tpu.memory_space<vmem>>, %arg2: memref<32x32xf32, #tpu.memory_space<vmem>>, %arg3: memref<32x32xf32, #tpu.memory_space<vmem>>, %arg4: memref<1x32xf32, #tpu.memory_space<vmem>>, %arg5: memref<1x32xf32, #tpu.memory_space<vmem>>, %arg6: memref<1x32xf32, #tpu.memory_space<vmem>>, %arg7: memref<32x32xf32, #tpu.memory_space<vmem>>, %arg8: memref<1x32xf32, #tpu.memory_space<vmem>>, %arg9: memref<2x32x256xf32, #tpu.memory_space<vmem>>) attributes {dimension_semantics = [#tpu.dimension_semantics<arbitrary>], iteration_bounds = array<i64: 1>, scalar_prefetch = 0 : i64, scratch_operands = 0 : i64, tpu.core_type = #tpu.core_type<tc>, window_params = [{pipeline_mode = #tpu.pipeline_mode<synchronous>, transform_indices = @transform_0, window_bounds = array<i64: 2, 32, 256>}, {pipeline_mode = #tpu.pipeline_mode<synchronous>, transform_indices = @transform_1, window_bounds = array<i64: 32, 32>}, {pipeline_mode = #tpu.pipeline_mode<synchronous>, transform_indices = @transform_2, window_bounds = array<i64: 32, 32>}, {pipeline_mode = #tpu.pipeline_mode<synchronous>, transform_indices = @transform_3, window_bounds = array<i64: 1, 32>}, {pipeline_mode = #tpu.pipeline_mode<synchronous>, transform_indices = @transform_4, window_bounds = array<i64: 1, 32>}, {pipeline_mode = #tpu.pipeline_mode<synchronous>, transform_indices = @transform_5, window_bounds = array<i64: 1, 32>}, {pipeline_mode = #tpu.pipeline_mode<synchronous>, transform_indices = @transform_6, window_bounds = array<i64: 32, 32>}, {pipeline_mode = #tpu.pipeline_mode<synchronous>, transform_indices = @transform_7, window_bounds = array<i64: 1, 32>}, {pipeline_mode = #tpu.pipeline_mode<synchronous>, transform_indices = @transform_8, window_bounds = array<i64: 2, 32, 256>}]} {
    %c0 = arith.constant 0 : index
    %c0_0 = arith.constant 0 : index
    %c0_1 = arith.constant 0 : index
    %0 = vector.load %arg1[%c0, %c0_0, %c0_1] : memref<2x32x256xf32, #tpu.memory_space<vmem>>, vector<2x32x256xf32>
    %cst = arith.constant 0.000000e+00 : f32
    %1 = vector.broadcast %cst : f32 to vector<2x32x256xf32>
    %2 = arith.maximumf %0, %1 : vector<2x32x256xf32>
    %cst_2 = arith.constant dense<0.000000e+00> : vector<2x32xf32>
    %3 = vector.multi_reduction <add>, %2, %cst_2 [2] : vector<2x32x256xf32> to vector<2x32xf32>
    %cst_3 = arith.constant dense<0.000000e+00> : vector<2x32xf32>
    %4 = vector.multi_reduction <add>, %0, %cst_3 [2] : vector<2x32x256xf32> to vector<2x32xf32>
    %c0_4 = arith.constant 0 : index
    %c0_5 = arith.constant 0 : index
    %5 = vector.load %arg2[%c0_4, %c0_5] : memref<32x32xf32, #tpu.memory_space<vmem>>, vector<32x32xf32>
    %c0_6 = arith.constant 0 : index
    %c0_7 = arith.constant 0 : index
    %6 = vector.load %arg3[%c0_6, %c0_7] : memref<32x32xf32, #tpu.memory_space<vmem>>, vector<32x32xf32>
    %c0_8 = arith.constant 0 : index
    %c0_9 = arith.constant 0 : index
    %7 = vector.load %arg4[%c0_8, %c0_9] : memref<1x32xf32, #tpu.memory_space<vmem>>, vector<1x32xf32>
    %c0_10 = arith.constant 0 : index
    %c0_11 = arith.constant 0 : index
    %8 = vector.load %arg5[%c0_10, %c0_11] : memref<1x32xf32, #tpu.memory_space<vmem>>, vector<1x32xf32>
    %c0_12 = arith.constant 0 : index
    %c0_13 = arith.constant 0 : index
    %9 = vector.load %arg6[%c0_12, %c0_13] : memref<1x32xf32, #tpu.memory_space<vmem>>, vector<1x32xf32>
    %c0_14 = arith.constant 0 : index
    %c0_15 = arith.constant 0 : index
    %10 = vector.load %arg7[%c0_14, %c0_15] : memref<32x32xf32, #tpu.memory_space<vmem>>, vector<32x32xf32>
    %c0_16 = arith.constant 0 : index
    %c0_17 = arith.constant 0 : index
    %11 = vector.load %arg8[%c0_16, %c0_17] : memref<1x32xf32, #tpu.memory_space<vmem>>, vector<1x32xf32>
    %cst_18 = arith.constant 3.906250e-03 : f32
    %12 = vector.broadcast %cst_18 : f32 to vector<2x32xf32>
    %13 = arith.mulf %3, %12 : vector<2x32xf32>
    %14 = arith.subf %4, %3 : vector<2x32xf32>
    %cst_19 = arith.constant 3.906250e-03 : f32
    %15 = vector.broadcast %cst_19 : f32 to vector<2x32xf32>
    %16 = arith.mulf %14, %15 : vector<2x32xf32>
    %cst_20 = arith.constant dense<0.000000e+00> : vector<2x32xf32>
    %17 = tpu.matmul %13, %5, %cst_20 {dimension_numbers = #tpu.dot_dimension_numbers<[1], [0], [0], [1], [0, 0, 1, 1], [], []>} : vector<2x32xf32>, vector<32x32xf32>, vector<2x32xf32> -> vector<2x32xf32>
    %cst_21 = arith.constant dense<0.000000e+00> : vector<2x32xf32>
    %18 = tpu.matmul %16, %6, %cst_21 {dimension_numbers = #tpu.dot_dimension_numbers<[1], [0], [0], [1], [0, 0, 1, 1], [], []>} : vector<2x32xf32>, vector<32x32xf32>, vector<2x32xf32> -> vector<2x32xf32>
    %19 = arith.addf %17, %18 : vector<2x32xf32>
    %20 = vector.broadcast %7 : vector<1x32xf32> to vector<2x32xf32>
    %21 = arith.addf %19, %20 : vector<2x32xf32>
    %cst_22 = arith.constant dense<0.000000e+00> : vector<32xf32>
    %22 = vector.multi_reduction <add>, %21, %cst_22 [0] : vector<2x32xf32> to vector<32xf32>
    %23 = vector.shape_cast %22 : vector<32xf32> to vector<1x32xf32>
    %cst_23 = arith.constant 2.000000e+00 : f32
    %24 = vector.broadcast %cst_23 : f32 to vector<1x32xf32>
    %25 = arith.divf %23, %24 : vector<1x32xf32>
    %26 = vector.broadcast %25 : vector<1x32xf32> to vector<2x32xf32>
    %27 = arith.subf %21, %26 : vector<2x32xf32>
    %28 = vector.broadcast %25 : vector<1x32xf32> to vector<2x32xf32>
    %29 = arith.subf %21, %28 : vector<2x32xf32>
    %30 = arith.mulf %27, %29 : vector<2x32xf32>
    %cst_24 = arith.constant dense<0.000000e+00> : vector<32xf32>
    %31 = vector.multi_reduction <add>, %30, %cst_24 [0] : vector<2x32xf32> to vector<32xf32>
    %32 = vector.shape_cast %31 : vector<32xf32> to vector<1x32xf32>
    %cst_25 = arith.constant 2.000000e+00 : f32
    %33 = vector.broadcast %cst_25 : f32 to vector<1x32xf32>
    %34 = arith.divf %32, %33 : vector<1x32xf32>
    %35 = vector.broadcast %25 : vector<1x32xf32> to vector<2x32xf32>
    %36 = arith.subf %21, %35 : vector<2x32xf32>
    %cst_26 = arith.constant 9.99999974E-6 : f32
    %37 = vector.broadcast %cst_26 : f32 to vector<1x32xf32>
    %38 = arith.addf %34, %37 : vector<1x32xf32>
    %39 = math.rsqrt %38 : vector<1x32xf32>
    %40 = vector.broadcast %39 : vector<1x32xf32> to vector<2x32xf32>
    %41 = arith.mulf %36, %40 : vector<2x32xf32>
    %42 = vector.broadcast %8 : vector<1x32xf32> to vector<2x32xf32>
    %43 = arith.mulf %41, %42 : vector<2x32xf32>
    %44 = vector.broadcast %9 : vector<1x32xf32> to vector<2x32xf32>
    %45 = arith.addf %43, %44 : vector<2x32xf32>
    %cst_27 = arith.constant 0.000000e+00 : f32
    %46 = vector.broadcast %cst_27 : f32 to vector<2x32xf32>
    %47 = arith.maximumf %45, %46 : vector<2x32xf32>
    %cst_28 = arith.constant dense<0.000000e+00> : vector<2x32xf32>
    %48 = tpu.matmul %47, %10, %cst_28 {dimension_numbers = #tpu.dot_dimension_numbers<[1], [0], [0], [1], [0, 0, 1, 1], [], []>} : vector<2x32xf32>, vector<32x32xf32>, vector<2x32xf32> -> vector<2x32xf32>
    %49 = vector.broadcast %11 : vector<1x32xf32> to vector<2x32xf32>
    %50 = arith.addf %48, %49 : vector<2x32xf32>
    %51 = arith.negf %50 : vector<2x32xf32>
    %52 = math.exp %51 : vector<2x32xf32>
    %cst_29 = arith.constant 1.000000e+00 : f32
    %53 = vector.broadcast %cst_29 : f32 to vector<2x32xf32>
    %54 = arith.addf %53, %52 : vector<2x32xf32>
    %55 = arith.divf %53, %54 : vector<2x32xf32>
    %cst_30 = arith.constant 0.000000e+00 : f32
    %56 = vector.broadcast %cst_30 : f32 to vector<2x32xf32>
    %57 = arith.subf %56, %55 : vector<2x32xf32>
    %58 = vector.shape_cast %57 : vector<2x32xf32> to vector<2x32x1xf32>
    %cst_31 = arith.constant 0.000000e+00 : f32
    %59 = vector.broadcast %cst_31 : f32 to vector<2x32x256xf32>
    %60 = arith.minimumf %0, %59 : vector<2x32x256xf32>
    %61 = vector.broadcast %58 : vector<2x32x1xf32> to vector<2x32x256xf32>
    %62 = arith.maximumf %60, %61 : vector<2x32x256xf32>
    %63 = arith.addf %2, %62 : vector<2x32x256xf32>
    %c0_32 = arith.constant 0 : index
    %c0_33 = arith.constant 0 : index
    %c0_34 = arith.constant 0 : index
    %64 = vector.load %arg9[%c0_32, %c0_33, %c0_34] : memref<2x32x256xf32, #tpu.memory_space<vmem>>, vector<2x32x256xf32>
    tpu.vector_store %arg9[%c0_32, %c0_33, %c0_34], %63 {strides = array<i32>} : memref<2x32x256xf32, #tpu.memory_space<vmem>>, vector<2x32x256xf32>,
    return
  }
  func.func @transform_0(%arg0: i32) -> (i32, i32, i32) {
    %c0_i32 = arith.constant 0 : i32
    %c0_i32_0 = arith.constant 0 : i32
    %c0_i32_1 = arith.constant 0 : i32
    %c0_i32_2 = arith.constant 0 : i32
    return %c0_i32, %c0_i32_0, %c0_i32_1 : i32, i32, i32
  }
  func.func @transform_1(%arg0: i32) -> (i32, i32) {
    %c0_i32 = arith.constant 0 : i32
    %c0_i32_0 = arith.constant 0 : i32
    %c0_i32_1 = arith.constant 0 : i32
    return %c0_i32, %c0_i32_0 : i32, i32
  }
  func.func @transform_2(%arg0: i32) -> (i32, i32) {
    %c0_i32 = arith.constant 0 : i32
    %c0_i32_0 = arith.constant 0 : i32
    %c0_i32_1 = arith.constant 0 : i32
    return %c0_i32, %c0_i32_0 : i32, i32
  }
  func.func @transform_3(%arg0: i32) -> (i32, i32) {
    %c0_i32 = arith.constant 0 : i32
    %c0_i32_0 = arith.constant 0 : i32
    %c0_i32_1 = arith.constant 0 : i32
    return %c0_i32, %c0_i32_0 : i32, i32
  }
  func.func @transform_4(%arg0: i32) -> (i32, i32) {
    %c0_i32 = arith.constant 0 : i32
    %c0_i32_0 = arith.constant 0 : i32
    %c0_i32_1 = arith.constant 0 : i32
    return %c0_i32, %c0_i32_0 : i32, i32
  }
  func.func @transform_5(%arg0: i32) -> (i32, i32) {
    %c0_i32 = arith.constant 0 : i32
    %c0_i32_0 = arith.constant 0 : i32
    %c0_i32_1 = arith.constant 0 : i32
    return %c0_i32, %c0_i32_0 : i32, i32
  }
  func.func @transform_6(%arg0: i32) -> (i32, i32) {
    %c0_i32 = arith.constant 0 : i32
    %c0_i32_0 = arith.constant 0 : i32
    %c0_i32_1 = arith.constant 0 : i32
    return %c0_i32, %c0_i32_0 : i32, i32
  }
  func.func @transform_7(%arg0: i32) -> (i32, i32) {
    %c0_i32 = arith.constant 0 : i32
    %c0_i32_0 = arith.constant 0 : i32
    %c0_i32_1 = arith.constant 0 : i32
    return %c0_i32, %c0_i32_0 : i32, i32
  }
  func.func @transform_8(%arg0: i32) -> (i32, i32, i32) {
    %c0_i32 = arith.constant 0 : i32
    %c0_i32_0 = arith.constant 0 : i32
    %c0_i32_1 = arith.constant 0 : i32
    %c0_i32_2 = arith.constant 0 : i32
    return %c0_i32, %c0_i32_0, %c0_i32_1 : i32, i32, i32
  }
}

</mosaic_0001>

<bundles_post_ra>
// kernel: tpu_custom_call.1
= control target key start
LH: loop header
LB: loop body
LE: loop exit
PB: predicated region body
PF: predicated region fallthrough
CT: control target
= control target key end

     0   :  { %13 = vsyncpa [#allocation3], 0  ;;  %s980_s0 = inlined_call_operand.hbm [shape: f32[2,32,256], index: 0, kind: input, shape index: {}]   ;;  %s981_s1 = inlined_call_operand.hbm [shape: f32[32,32], index: 1, kind: input, shape index: {}]   ;;  %s982_s2 = inlined_call_operand.hbm [shape: f32[32,32], index: 2, kind: input, shape index: {}]   ;;  %s983_s3 = inlined_call_operand.vmem [shape: f32[1,32], index: 3, kind: input, shape index: {}]   ;;  %s984_s4 = inlined_call_operand.vmem [shape: f32[1,32], index: 4, kind: input, shape index: {}]   ;;  %s985_s5 = inlined_call_operand.vmem [shape: f32[1,32], index: 5, kind: input, shape index: {}]   ;;  %s986_s6 = inlined_call_operand.hbm [shape: f32[32,32], index: 6, kind: input, shape index: {}]   ;;  %s987_s7 = inlined_call_operand.vmem [shape: f32[1,32], index: 7, kind: input, shape index: {}]   ;;  %s988_s8 = inlined_call_operand.hbm [shape: f32[2,32,256], index: 8, kind: output, shape index: {}]  }
   0x1   :  { %14 = vsyncpa [#allocation6], 0 }
   0x2   :  { %15 = vsyncpa [#allocation9], 0  ;;  %s34_s29 = sshll.u32 %s981_s1, 4  ;;  %s35_s29 = int_to_ptr.hbm [resolvable:$true] %s34_s29 }
   0x3   :  { %16 = vsyncpa [#allocation4], 0  ;;  %s707_s30 = smov [#allocation5]   ;;  %s21_s12 = sshll.u32 %s980_s0, 4  ;;  %s22_s12 = int_to_ptr.hbm [resolvable:$true] %s21_s12 }
   0x4   :  { %s36_s9 = sshll.u32 %s707_s30, 4  ;;  %s708_s13 = smov 128   ;;  %s37_s9 = int_to_ptr.vmem [resolvable:$true] %s36_s9 }
   0x5   :  { %s709_s14 = smov 8   ;;  %s710_s15 = smov [#allocation2]  }
   0x6   :  { %42 = dma.hbm_to_vmem [thread:$0]  %s35_s29, 512, %s37_s9, [#allocation6], %s708_s13, %s708_s13, %s709_s14  }
   0x7   :  { %s23_s16 = sshll.u32 %s710_s15, 4  ;;  %s711_s17 = smov 256   ;;  %s24_s16 = int_to_ptr.vmem [resolvable:$true] %s23_s16 }
   0x8   :  { %s712_s18 = smov 16   ;;  %s47_s20 = sshll.u32 %s982_s2, 4  ;;  %s48_s20 = int_to_ptr.hbm [resolvable:$true] %s47_s20 }
   0x9   :  { %29 = dma.hbm_to_vmem [thread:$0]  %s22_s12, 2048, %s24_s16, [#allocation3], %s711_s17, %s711_s17, %s712_s18  }
   0xa   :  { %s713_s21 = smov [#allocation7]   ;;  %s66_s24 = sshll.u32 %s986_s6, 4  ;;  %s67_s24 = int_to_ptr.hbm [resolvable:$true] %s66_s24 }
   0xb   :  { %s49_s0 = sshll.u32 %s713_s21, 4  ;;  %s714_s25 = smov [#allocation8]   ;;  %s50_s0 = int_to_ptr.vmem [resolvable:$true] %s49_s0 }
   0xc   :  { %55 = dma.hbm_to_vmem [thread:$0]  %s48_s20, 512, %s50_s0, [#allocation6], %s708_s13, %s708_s13, %s709_s14  }
   0xd   :  { %s68_s26 = sshll.u32 %s714_s25, 4  ;;  %s69_s26 = int_to_ptr.vmem [resolvable:$true] %s68_s26 }
   0xe   :  { %74 = dma.hbm_to_vmem [thread:$0]  %s67_s24, 512, %s69_s26, [#allocation9], %s708_s13, %s708_s13, %s709_s14  }
   0xf   :  { %699 = dma.done.wait [#allocation3], 2048  }
  0x10   :  { %700 = vsyncadd [#allocation3], 4294965248 }
  0x11   :  { %701 = dma.done.wait [#allocation6], 1024  }
  0x12   :  { %702 = vsyncadd [#allocation6], 4294966272 }
  0x13   :  { %703 = dma.done.wait [#allocation9], 512  }
  0x14   :  { %704 = vsyncadd [#allocation9], 4294966784  ;;  %v777_v0 = vld [vmem:[#allocation2] sm:$0xff]  ;;  %v779_v1 = vld [vmem:[#allocation2 + $0x8] sm:$0xff]  ;;  %vm226_vm0 = vcmask 130112   ;;  %vm230_vm1 = vcmask 195712  }
  0x15   :  { %v781_v2 = vld [vmem:[#allocation2 + $0x40] sm:$0xff]  ;;  %v149_v3 = vadd.f32 %v779_v1, %v777_v0  ;;  %v785_v4 = vld [vmem:[#allocation2 + $0x48] sm:$0xff]  ;;  %v109_v6 = vmax.f32 %v777_v0, 0.0  ;;  %v110_v7 = vmax.f32 %v779_v1, 0.0  ;;  %v791_v9 = vld [vmem:[#allocation2 + $0x10] sm:$0xff]  ;;  %vm234_vm2 = vcmask 261312  }
  0x16   :  { %v994_v5 = vmax.f32 %v781_v2, 0.0  ;;  %v993_v8 = vmax.f32 %v785_v4, 0.0  ;;  %v793_v10 = vld [vmem:[#allocation2 + $0x18] sm:$0xff]  ;;  %v799_v12 = vld [vmem:[#allocation2 + $0x50] sm:$0xff]  ;;  %v111_v15 = vmax.f32 %v791_v9, 0.0  ;;  %v813_v20 = vld [vmem:[#allocation2 + $0x20] sm:$0xff]  ;;  %v161_v27 = vadd.f32 %v785_v4, %v781_v2 }
  0x17   :  { %150 = vadd.xlane.f32.xlu2 %v149_v3  ;;  %v125_v11 = vadd.f32 %v110_v7, %v109_v6  ;;  %v801_v13 = vld [vmem:[#allocation2 + $0x58] sm:$0xff]  ;;  %v112_v16 = vmax.f32 %v793_v10, 0.0  ;;  %v119_v17 = vmax.f32 %v799_v12, 0.0  ;;  %v152_v19 = vadd.f32 %v793_v10, %v791_v9  ;;  %v815_v21 = vld [vmem:[#allocation2 + $0x28] sm:$0xff]  ;;  %v835_v29 = vld [vmem:[#allocation2 + $0x60] sm:$0xff]  ;;  %s530_s11 = sshll.u32 %s988_s8, 4  ;;  %s531_s11 = int_to_ptr.hbm [resolvable:$true] %s530_s11 }
  0x18   :  { %v137_v14 = vadd.f32 %v993_v8, %v994_v5  ;;  %v995_v18 = vmax.f32 %v801_v13, 0.0  ;;  %v113_v24 = vmax.f32 %v813_v20, 0.0  ;;  %v114_v25 = vmax.f32 %v815_v21, 0.0  ;;  %v837_v30 = vld [vmem:[#allocation2 + $0x68] sm:$0xff]  ;;  %v849_v36 = vld [vmem:[#allocation2 + $0x30] sm:$0xff]  ;;  %v851_v37 = vld [vmem:[#allocation2 + $0x38] sm:$0xff] }
  0x19   :  { %126 = vadd.xlane.f32.xlu0 %v125_v11  ;;  %v128_v22 = vadd.f32 %v112_v16, %v111_v15  ;;  %v164_v28 = vadd.f32 %v801_v13, %v799_v12  ;;  %v990_v31 = vmax.f32 %v835_v29, 0.0  ;;  %v989_v32 = vmax.f32 %v837_v30, 0.0  ;;  %v853_v38 = vld [vmem:[#allocation2 + $0x70] sm:$0xff]  ;;  %v855_v39 = vld [vmem:[#allocation2 + $0x78] sm:$0xff]  ;;  %v174_v53 = vld [vmem:[#allocation5 + $0x8] sm:$0xff] }
  0x1a   :  { %138 = vadd.xlane.f32.xlu1 %v137_v14  ;;  %v140_v23 = vadd.f32 %v995_v18, %v119_v17  ;;  %v131_v26 = vadd.f32 %v114_v25, %v113_v24  ;;  %v167_v33 = vadd.f32 %v837_v30, %v835_v29  ;;  %v155_v35 = vadd.f32 %v815_v21, %v813_v20  ;;  %v176_v49 = vld [vmem:[#allocation5 + $0x18] sm:$0xff]  ;;  %v175_v52 = vld [vmem:[#allocation5 + $0x10] sm:$0xff]  ;;  %v173_v54 = vld [vmem:[#allocation5] sm:$0xff] }
  0x1b   :  { %v143_v34 = vadd.f32 %v989_v32, %v990_v31  ;;  %v115_v40 = vmax.f32 %v849_v36, 0.0  ;;  %v116_v41 = vmax.f32 %v851_v37, 0.0  ;;  %v992_v42 = vmax.f32 %v853_v38, 0.0  ;;  %305 = vmatpush.msra.mxu1 %v176_v49  ;;  %v180_v58 = vld [vmem:[#allocation7 + $0x18] sm:$0xff]  ;;  %v179_v59 = vld [vmem:[#allocation7 + $0x10] sm:$0xff]  ;;  %v178_v60 = vld [vmem:[#allocation7 + $0x8] sm:$0xff] }
  0x1c   :  { %v991_v43 = vmax.f32 %v855_v39, 0.0  ;;  %v158_v44 = vadd.f32 %v851_v37, %v849_v36  ;;  %v170_v47 = vadd.f32 %v855_v39, %v853_v38  ;;  %260 = vmatpush.msra.mxu0 %v180_v58  ;;  %v177_v62 = vld [vmem:[#allocation7] sm:$0xff]  ;;  %v221_v11 = vlaneseq }
  0x1d   :  { %v134_v45 = vadd.f32 %v116_v41, %v115_v40  ;;  %306 = vmatpush.msra.mxu1 %v175_v52  ;;  %vm243_vm3 = vcmask 1041409   ;;  %vm245_vm4 = vcmask 261120   ;;  %vm317_vm5 = vcmask 254976  }
  0x1e   :  { %v146_v46 = vadd.f32 %v991_v43, %v992_v42  ;;  %261 = vmatpush.msra.mxu0 %v179_v59 }
  0x1f   :  { %153 = vadd.xlane.f32.xlu2 %v152_v19  ;;  %307 = vmatpush.msra.mxu1 %v174_v53 }
  0x20   :  { %262 = vmatpush.msra.mxu0 %v178_v60 }
  0x21   :  { %129 = vadd.xlane.f32.xlu0 %v128_v22  ;;  %308 = vmatpush.msra.mxu1 %v173_v54  ;;  %v880_v22 = vand.u32 127, %v221_v11 }
  0x22   :  { %141 = vadd.xlane.f32.xlu1 %v140_v23  ;;  %263 = vmatpush.msra.mxu0 %v177_v62 }
  0x27   :  { %132 = vadd.xlane.f32.xlu2 %v131_v26 }
  0x29   :  { %162 = vadd.xlane.f32.xlu0 %v161_v27 }
  0x2a   :  { %165 = vadd.xlane.f32.xlu1 %v164_v28  ;;  %v224_v28 = vadd.s32 4294967288, %v880_v22 }
  0x2f   :  { %168 = vadd.xlane.f32.xlu2 %v167_v33 }
  0x31   :  { %144 = vadd.xlane.f32.xlu0 %v143_v34 }
  0x32   :  { %156 = vadd.xlane.f32.xlu1 %v155_v35  ;;  %v228_v35 = vadd.s32 4294967280, %v880_v22 }
  0x37   :  { %159 = vadd.xlane.f32.xlu2 %v158_v44 }
  0x39   :  { %135 = vadd.xlane.f32.xlu0 %v134_v45 }
  0x3a   :  { %147 = vadd.xlane.f32.xlu1 %v146_v46  ;;  %v232_v46 = vadd.s32 4294967272, %v880_v22 }
  0x41   :  { %171 = vadd.xlane.f32.xlu0 %v170_v47 }
  0x8a   :  { %v873_v48 = vpop.xlane.xlu2 %150 }
  0x8c   :  { %v875_v50 = vpop.xlane.xlu0 %126 }
  0x8d   :  { %v877_v51 = vpop.xlane.xlu1 %138  ;;  %v189_v27 = vmul.f32 0.00390625, %v875_v50  ;;  %v197_v49 = vsub.f32 %v873_v48, %v875_v50 }
  0x8e   :  { %v193_v26 = vmul.f32 0.00390625, %v877_v51 }
  0x8f   :  { %v276_v52 = vperm.slane %v189_v27, %v880_v22 }
  0x90   :  { %v283_v47 = vperm.slane %v193_v26, %v880_v22 }
  0x92   :  { %v154_v55 = vpop.xlane.xlu2 %153 }
  0x94   :  { %v130_v56 = vpop.xlane.xlu0 %129 }
  0x95   :  { %v142_v57 = vpop.xlane.xlu1 %141  ;;  %v190_v33 = vmul.f32 0.00390625, %v130_v56  ;;  %v198_v58 = vsub.f32 %v154_v55, %v130_v56 }
  0x96   :  { %v194_v34 = vmul.f32 0.00390625, %v142_v57 }
  0x97   :  { %v277_v53 = vperm.slane %v190_v33, %v224_v28  ;;  %v206_v56 = vmul.f32 0.00390625, %v198_v58 }
  0x98   :  { %v284_v54 = vperm.slane %v194_v34, %v224_v28  ;;  %v205_v34 = vmul.f32 0.00390625, %v197_v49 }
  0x99   :  { %v278_v48 = vsel %vm226_vm0, %v277_v53, %v276_v52 }
  0x9a   :  { %v133_v61 = vpop.xlane.xlu2 %132  ;;  %v285_v55 = vsel %vm226_vm0, %v284_v54, %v283_v47 }
  0x9b   :  { %v191_v44 = vmul.f32 0.00390625, %v133_v61 }
  0x9c   :  { %v163_v63 = vpop.xlane.xlu0 %162 }
  0x9d   :  { %v166_v3 = vpop.xlane.xlu1 %165  ;;  %v279_v59 = vperm.slane %v191_v44, %v228_v35  ;;  %v201_v31 = vsub.f32 %v163_v63, %v877_v51 }
  0x9e   :  { %v202_v32 = vsub.f32 %v166_v3, %v142_v57 }
  0x9f   :  { %v280_v57 = vsel %vm230_vm1, %v279_v59, %v278_v48  ;;  %v209_v51 = vmul.f32 0.00390625, %v201_v31 }
  0xa0   :  { %v210_v3 = vmul.f32 0.00390625, %v202_v32 }
  0xa1   :  { %v236_v32 = vperm.slane %v209_v51, %v880_v22 }
  0xa2   :  { %v169_v14 = vpop.xlane.xlu2 %168  ;;  %v237_v47 = vperm.slane %v210_v3, %v224_v28 }
  0xa4   :  { %v145_v19 = vpop.xlane.xlu0 %144  ;;  %v238_v58 = vsel %vm226_vm0, %v237_v47, %v236_v32 }
  0xa5   :  { %v157_v23 = vpop.xlane.xlu1 %156  ;;  %v195_v45 = vmul.f32 0.00390625, %v145_v19  ;;  %v203_v26 = vsub.f32 %v169_v14, %v145_v19 }
  0xa6   :  { %v199_v5 = vsub.f32 %v157_v23, %v133_v61 }
  0xa7   :  { %v286_v43 = vperm.slane %v195_v45, %v228_v35  ;;  %v211_v19 = vmul.f32 0.00390625, %v203_v26 }
  0xa8   :  { %v207_v14 = vmul.f32 0.00390625, %v199_v5 }
  0xa9   :  { %v287_v61 = vsel %vm230_vm1, %v286_v43, %v285_v55  ;;  %v239_v53 = vperm.slane %v211_v19, %v228_v35  ;;  %v223_v43 = vperm.slane %v205_v34, %v880_v22  ;;  %v715_v22 = vmov 2.0  }
  0xaa   :  { %v160_v60 = vpop.xlane.xlu2 %159  ;;  %v229_v52 = vperm.slane %v207_v14, %v228_v35  ;;  %571 = vrcp.f32 %v715_v22 }
  0xac   :  { %v136_v62 = vpop.xlane.xlu0 %135 }
  0xad   :  { %v148_v42 = vpop.xlane.xlu1 %147  ;;  %v192_v8 = vmul.f32 0.00390625, %v136_v62  ;;  %v200_v50 = vsub.f32 %v160_v60, %v136_v62  ;;  %v240_v62 = vsel %vm230_vm1, %v239_v53, %v238_v58  ;;  %v186_v53 = vld [vmem:[#allocation8 + $0x10] sm:$0xff]  ;;  %v184_v58 = vld [vmem:[#allocation8] sm:$0xff] }
  0xae   :  { %v196_v18 = vmul.f32 0.00390625, %v148_v42 }
  0xaf   :  { %v281_v27 = vperm.slane %v192_v8, %v232_v46  ;;  %v208_v44 = vmul.f32 0.00390625, %v200_v50 }
  0xb0   :  { %v288_v33 = vperm.slane %v196_v18, %v232_v46  ;;  %v225_v18 = vperm.slane %v206_v56, %v224_v28  ;;  %v572_v35 = vpop.eup %571 }
  0xb1   :  { %v282_v63 = vsel %vm234_vm2, %v281_v27, %v280_v57  ;;  %v233_v5 = vperm.slane %v208_v44, %v232_v46  ;;  %v326_v48 = vmul.f32 2.0, %v572_v35  ;;  %vm330_vm6 = vweird.f32 %v572_v35 }
  0xb2   :  { %v289_v23 = vsel %vm234_vm2, %v288_v33, %v287_v61  ;;  %v227_v59 = vsel %vm226_vm0, %v225_v18, %v223_v43 }
  0xb3   :  { %v290_v8 = vsel %vm243_vm3, %v289_v23, %v282_v63  ;;  %v231_v60 = vsel %vm230_vm1, %v229_v52, %v227_v59  ;;  %v327_v33 = vsub.f32 1.0, %v326_v48  ;;  %v187_v52 = vld [vmem:[#allocation8 + $0x18] sm:$0xff]  ;;  %v568_v48 = vld [vmem:[%s984_s4] ss:$0 sm:$0xff] }
  0xb4   :  { %546 = vmatmul.msk.f32.vlgmr.msra.gmra.mxu1 %vm245_vm4, %v290_v8  ;;  %v172_v45 = vpop.xlane.xlu0 %171  ;;  %v235_v28 = vsel %vm234_vm2, %v233_v5, %v231_v60  ;;  %382 = vmatpush.msra.mxu2 %v187_v52  ;;  %v185_v5 = vld [vmem:[#allocation8 + $0x8] sm:$0xff] }
  0xb5   :  { %v204_v31 = vsub.f32 %v172_v45, %v148_v42  ;;  %v328_v51 = vmul.f32 %v572_v35, %v327_v33 }
  0xb6   :  { %383 = vmatpush.msra.mxu2 %v186_v53 }
  0xb7   :  { %v212_v54 = vmul.f32 0.00390625, %v204_v31  ;;  %v329_v14 = vadd.f32 %v572_v35, %v328_v51 }
  0xb8   :  { %384 = vmatpush.msra.mxu2 %v185_v5 }
  0xb9   :  { %v241_v49 = vperm.slane %v212_v54, %v232_v46  ;;  %v567_v46 = vld [vmem:[%s983_s3] ss:$0 sm:$0xff]  ;;  %v331_v34 = vsel %vm330_vm6, %v572_v35, %v329_v14 }
  0xba   :  { %385 = vmatpush.msra.mxu2 %v184_v58 }
  0xbb   :  { %v242_v26 = vsel %vm234_vm2, %v241_v49, %v240_v62 }
  0xbc   :  { %v244_v42 = vsel %vm243_vm3, %v242_v26, %v235_v28 }
  0xbd   :  { %545 = vmatmul.msk.f32.vlgmr.msra.gmra.mxu0 %vm245_vm4, %v244_v42 }
 0x131   :  { %v310_v50 = vpop.f32.mrf.mxu1 }
 0x13a   :  { %v265_v27 = vpop.f32.mrf.mxu0 }
 0x13b   :  { %v311_v55 = vadd.f32 %v310_v50, %v265_v27 }
 0x13d   :  { %v316_v56 = vadd.f32 %v567_v46, %v311_v55  ;;  %v569_v55 = vld [vmem:[%s985_s5] ss:$0 sm:$0xff]  ;;  %s716_s5 = smov [#allocation10]  }
 0x13f   :  { %v318_v57 = vsel %vm317_vm5, %v316_v56, 0.0 }
 0x140   :  { %v319_v3 = vrot.slane %v318_v57, 4 }
 0x142   :  { %v320_v63 = vadd.f32 %v319_v3, %v318_v57  ;;  %v412_v3 = vshrl.u32 %v221_v11, 7 }
 0x144   :  { %v321_v61 = vrot.slane %v320_v63, 2  ;;  %559 = vset.pattern.permute.xlu1 %v412_v3  ;;  %v425_v51 = vadd.s32 16, %v412_v3  ;;  %v431_v58 = vadd.s32 24, %v412_v3 }
 0x146   :  { %v322_v19 = vadd.f32 %v321_v61, %v320_v63  ;;  %v419_v63 = vadd.s32 8, %v412_v3  ;;  %561 = vset.pattern.permute.xlu0 %v425_v51  ;;  %v570_v61 = vld [vmem:[%s987_s7] ss:$0 sm:$0xff]  ;;  %s528_s7 = sshll.u32 %s716_s5, 4  ;;  %s529_s7 = int_to_ptr.vmem [resolvable:$true] %s528_s7 }
 0x148   :  { %v323_v23 = vrot.slane %v322_v19, 1  ;;  %560 = vset.pattern.permute.xlu2 %v419_v63 }
 0x14a   :  { %v324_v44 = vadd.f32 %v323_v23, %v322_v19 }
 0x14c   :  { %v332_v8 = vmul.f32 %v331_v34, %v324_v44 }
 0x14e   :  { %v333_v45 = vsub.f32 %v316_v56, %v332_v8 }
 0x150   :  { %v334_v18 = vmul.f32 %v333_v45, %v333_v45 }
 0x152   :  { %v335_v47 = vsel %vm317_vm5, %v334_v18, 0.0 }
 0x153   :  { %v336_v32 = vrot.slane %v335_v47, 4 }
 0x155   :  { %v337_v31 = vadd.f32 %v336_v32, %v335_v47 }
 0x157   :  { %v338_v43 = vrot.slane %v337_v31, 2 }
 0x159   :  { %v339_v54 = vadd.f32 %v338_v43, %v337_v31 }
 0x15b   :  { %v340_v49 = vrot.slane %v339_v54, 1 }
 0x15d   :  { %v341_v59 = vadd.f32 %v340_v49, %v339_v54 }
 0x15f   :  { %v342_v60 = vmul.f32 %v341_v59, %v331_v34  ;;  %v462_v59 = vmin.f32 %v791_v9, 0.0  ;;  %v464_v9 = vmin.f32 %v813_v20, 0.0  ;;  %v469_v20 = vmin.f32 %v785_v4, 0.0 }
 0x161   :  { %v343_v62 = vadd.f32 1e-05, %v342_v60  ;;  %v463_v60 = vmin.f32 %v793_v10, 0.0  ;;  %v465_v10 = vmin.f32 %v815_v21, 0.0 }
 0x163   :  { %573 = vrsqrt.f32 %v343_v62  ;;  %vm350_vm8 = vweird.f32 %v343_v62 }
 0x169   :  { %v574_v28 = vpop.eup %573 }
 0x16a   :  { %v345_v26 = vmul.f32 %v574_v28, %v343_v62  ;;  %vm351_vm7 = vweird.f32 %v574_v28 }
 0x16b   :  { %vm352_vm9 = vmor %vm350_vm8, %vm351_vm7 }
 0x16c   :  { %v346_v42 = vmul.f32 %v574_v28, %v345_v26 }
 0x16e   :  { %v347_v22 = vmul.f32 0.5, %v346_v42 }
 0x170   :  { %v348_v35 = vsub.f32 1.5, %v347_v22 }
 0x172   :  { %v349_v46 = vmul.f32 %v574_v28, %v348_v35  ;;  %v466_v35 = vmin.f32 %v849_v36, 0.0 }
 0x174   :  { %v353_v50 = vsel %vm352_vm9, %v574_v28, %v349_v46  ;;  %v467_v46 = vmin.f32 %v851_v37, 0.0 }
 0x175   :  { %v354_v27 = vmul.f32 %v353_v50, %v333_v45 }
 0x177   :  { %v358_v56 = vmul.f32 %v568_v48, %v354_v27 }
 0x179   :  { %v362_v33 = vadd.f32 %v569_v55, %v358_v56 }
 0x17b   :  { %v363_v57 = vmax.f32 %v362_v33, 0.0 }
 0x17d   :  { %547 = vmatmul.msk.f32.vlgmr.msra.gmra.mxu2 %vm245_vm4, %v363_v57 }
 0x200   :  { %v387_v14 = vpop.f32.mrf.mxu2 }
 0x201   :  { %v388_v19 = vadd.f32 %v570_v61, %v387_v14  ;;  %v470_v14 = vmin.f32 %v799_v12, 0.0  ;;  %v472_v12 = vmin.f32 %v835_v29, 0.0 }
 0x203   :  { %v548_v23 = vmul.f32 -1.442695, %v388_v19  ;;  %v471_v19 = vmin.f32 %v801_v13, 0.0 }
 0x205   :  { %575 = vpow2.f32 %v548_v23  ;;  %v468_v23 = vmin.f32 %v781_v2, 0.0 }
 0x20b   :  { %v576_v34 = vpop.eup %575 }
 0x20c   :  { %v393_v44 = vadd.f32 1.0, %v576_v34 }
 0x20e   :  { %577 = vrcp.f32 %v393_v44  ;;  %v405_v11 = vand.u32 2147483648, %v393_v44  ;;  %v403_v32 = vand.u32 2147483647, %v393_v44  ;;  %vm399_vm11 = vweird.f32 %v393_v44 }
 0x210   :  { %v406_v52 = vor.u32 1.1754944e-38, %v405_v11  ;;  %vm404_vm13 = vcmp.eq.f32.partialorder %v403_v32, 8.507059e+37  ;;  %v475_v32 = vmin.f32 %v855_v39, 0.0 }
 0x214   :  { %v578_v8 = vpop.eup %577 }
 0x215   :  { %v395_v45 = vmul.f32 %v578_v8, %v393_v44  ;;  %vm400_vm10 = vweird.f32 %v578_v8 }
 0x216   :  { %vm401_vm12 = vmor %vm399_vm11, %vm400_vm10 }
 0x217   :  { %v396_v18 = vsub.f32 1.0, %v395_v45 }
 0x219   :  { %v397_v47 = vmul.f32 %v578_v8, %v396_v18  ;;  %v998_v18 = vmax.f32 %v785_v4, 0.0  ;;  %v999_v4 = vmax.f32 %v853_v38, 0.0 }
 0x21b   :  { %v398_v31 = vadd.f32 %v578_v8, %v397_v47  ;;  %v474_v47 = vmin.f32 %v853_v38, 0.0 }
 0x21d   :  { %v402_v53 = vsel %vm401_vm12, %v578_v8, %v398_v31  ;;  %v997_v8 = vmax.f32 %v781_v2, 0.0 }
 0x21e   :  { %v407_v43 = vsel %vm404_vm13, %v406_v52, %v402_v53 }
 0x21f   :  { %v409_v5 = vsub.f32 0.0, %v407_v43 }
 0x221   :  { %v410_v54 = vperm.slane %v409_v5, 0  ;;  %v435_v49 = vperm.slane %v409_v5, 1 }
 0x223   :  { %427 = vperm.xlu0 %561, %v410_v54   ;;  %421 = vperm.xlu2 %560, %v410_v54  }
 0x224   :  { %415 = vperm.xlu1 %559, %v410_v54  }
 0x22b   :  { %562 = vset.pattern.permute.xlu2 %v431_v58  ;;  %566 = vset.pattern.permute.xlu0 %v431_v58 }
 0x22c   :  { %440 = vperm.xlu1 %559, %v435_v49  }
 0x233   :  { %433 = vperm.xlu2 %562, %v410_v54   ;;  %v1000_v54 = vmax.f32 %v855_v39, 0.0 }
 0x234   :  { %564 = vset.pattern.permute.xlu1 %v425_v51 }
 0x23b   :  { %563 = vset.pattern.permute.xlu2 %v419_v63 }
 0x23c   :  { %452 = vperm.xlu1 %564, %v435_v49  }
 0x243   :  { %446 = vperm.xlu2 %563, %v435_v49  }
 0x24b   :  { %565 = vset.pattern.permute.xlu2 %v431_v58 }
 0x253   :  { %458 = vperm.xlu2 %565, %v435_v49   ;;  %v1001_v49 = vmax.f32 %v835_v29, 0.0 }
 0x27d   :  { %v422_v62 = vpop.permute.xlu2 %421 }
 0x27e   :  { %v478_v28 = vmax.f32 %v462_v59, %v422_v62  ;;  %v479_v26 = vmax.f32 %v463_v60, %v422_v62  ;;  %v1002_v60 = vmax.f32 %v837_v30, 0.0 }
 0x280   :  { %v494_v42 = vadd.f32 %v478_v28, %v111_v15  ;;  %v495_v22 = vadd.f32 %v479_v26, %v112_v16  ;;  %v460_v15 = vmin.f32 %v777_v0, 0.0  ;;  %v461_v16 = vmin.f32 %v779_v1, 0.0 }
 0x282   :  { %510 = vst [vmem:[#allocation10 + $0x10] sm:$0xff] %v494_v42 }
 0x283   :  { %511 = vst [vmem:[#allocation10 + $0x18] sm:$0xff] %v495_v22 }
 0x28d   :  { %v434_v48 = vpop.permute.xlu2 %433 }
 0x28e   :  { %v482_v50 = vmax.f32 %v466_v35, %v434_v48  ;;  %v483_v27 = vmax.f32 %v467_v46, %v434_v48 }
 0x290   :  { %v498_v55 = vadd.f32 %v482_v50, %v115_v40  ;;  %v499_v56 = vadd.f32 %v483_v27, %v116_v41 }
 0x292   :  { %514 = vst [vmem:[#allocation10 + $0x30] sm:$0xff] %v498_v55 }
 0x293   :  { %515 = vst [vmem:[#allocation10 + $0x38] sm:$0xff] %v499_v56 }
 0x295   :  { %v428_v33 = vpop.permute.xlu0 %427 }
 0x296   :  { %v480_v57 = vmax.f32 %v464_v9, %v428_v33  ;;  %v481_v3 = vmax.f32 %v465_v10, %v428_v33  ;;  %v416_v51 = vpop.permute.xlu1 %415 }
 0x297   :  { %v476_v63 = vmax.f32 %v460_v15, %v416_v51  ;;  %v477_v36 = vmax.f32 %v461_v16, %v416_v51 }
 0x298   :  { %v496_v37 = vadd.f32 %v480_v57, %v113_v24  ;;  %v497_v40 = vadd.f32 %v481_v3, %v114_v25 }
 0x299   :  { %v492_v41 = vadd.f32 %v476_v63, %v109_v6  ;;  %v493_v61 = vadd.f32 %v477_v36, %v110_v7  ;;  %v996_v7 = vmax.f32 %v801_v13, 0.0 }
 0x29a   :  { %512 = vst [vmem:[#allocation10 + $0x20] sm:$0xff] %v496_v37 }
 0x29b   :  { %513 = vst [vmem:[#allocation10 + $0x28] sm:$0xff] %v497_v40 }
 0x29c   :  { %508 = vst [vmem:[#allocation10] sm:$0xff] %v492_v41 }
 0x29d   :  { %509 = vst [vmem:[#allocation10 + $0x8] sm:$0xff] %v493_v61  ;;  %v447_v21 = vpop.permute.xlu2 %446 }
 0x29e   :  { %v486_v24 = vmax.f32 %v470_v14, %v447_v21  ;;  %v487_v25 = vmax.f32 %v471_v19, %v447_v21  ;;  %v441_v0 = vpop.permute.xlu1 %440 }
 0x29f   :  { %v484_v6 = vmax.f32 %v468_v23, %v441_v0  ;;  %v485_v34 = vmax.f32 %v469_v20, %v441_v0 }
 0x2a0   :  { %v502_v1 = vadd.f32 %v486_v24, %v119_v17  ;;  %v503_v44 = vadd.f32 %v487_v25, %v996_v7  ;;  %v473_v17 = vmin.f32 %v837_v30, 0.0 }
 0x2a1   :  { %v500_v45 = vadd.f32 %v484_v6, %v997_v8  ;;  %v501_v11 = vadd.f32 %v485_v34, %v998_v18 }
 0x2a2   :  { %518 = vst [vmem:[#allocation10 + $0x50] sm:$0xff] %v502_v1 }
 0x2a3   :  { %519 = vst [vmem:[#allocation10 + $0x58] sm:$0xff] %v503_v44 }
 0x2a4   :  { %516 = vst [vmem:[#allocation10 + $0x40] sm:$0xff] %v500_v45 }
 0x2a5   :  { %517 = vst [vmem:[#allocation10 + $0x48] sm:$0xff] %v501_v11 }
 0x2ad   :  { %v459_v13 = vpop.permute.xlu2 %458 }
 0x2ae   :  { %v490_v31 = vmax.f32 %v474_v47, %v459_v13  ;;  %v491_v52 = vmax.f32 %v475_v32, %v459_v13  ;;  %v453_v2 = vpop.permute.xlu1 %452 }
 0x2af   :  { %v488_v53 = vmax.f32 %v472_v12, %v453_v2  ;;  %v489_v43 = vmax.f32 %v473_v17, %v453_v2 }
 0x2b0   :  { %v506_v5 = vadd.f32 %v490_v31, %v999_v4  ;;  %v507_v58 = vadd.f32 %v491_v52, %v1000_v54 }
 0x2b1   :  { %v504_v59 = vadd.f32 %v488_v53, %v1001_v49  ;;  %v505_v62 = vadd.f32 %v489_v43, %v1002_v60 }
 0x2b2   :  { %522 = vst [vmem:[#allocation10 + $0x70] sm:$0xff] %v506_v5 }
 0x2b3   :  { %523 = vst [vmem:[#allocation10 + $0x78] sm:$0xff] %v507_v58 }
 0x2b4   :  { %520 = vst [vmem:[#allocation10 + $0x60] sm:$0xff] %v504_v59 }
 0x2b5   :  { %521 = vst [vmem:[#allocation10 + $0x68] sm:$0xff] %v505_v62 }
 0x2b6   :  { %536 = dma.vmem_to_hbm [thread:$0]  %s529_s7, 2048, %s531_s11, [#allocation4], %s711_s17, %s711_s17, %s712_s18  }
 0x2b7   :  { %705 = dma.done.wait [#allocation4], 2048  }
 0x2b8   :  { %706 = vsyncadd [#allocation4], 4294965248 }
 0x2b9   :  { %541 = vsyncpa [#allocation3], 1 }
 0x2ba   :  { %542 = vsyncpa [#allocation6], 1 }
 0x2bb   :  { %543 = vsyncpa [#allocation9], 1 }
 0x2bc   :  { %544 = vsyncpa [#allocation4], 1 }

</bundles_post_ra>
